<compile_context>
chip_gen: v7x
topology: tpu7x:2x2x1
jax: 0.10.0
libtpu: 0.0.40
codegen_flags: <defaults>
</compile_context>

<pallas_src>
import jax
import jax.numpy as jnp
from jax.experimental import pallas as pl
from jax.experimental.pallas import tpu as pltpu


# --------------------------------------------------------------------------- #
# Kernel
# --------------------------------------------------------------------------- #
def agent_kernel(a_ref, x_ref, w1_ref, b1_ref, w2_ref, b2_ref, wh_ref, bh_ref,
                 out_ref):
    """One grid step: full batched GCN + pooled features, one head tile.

    a_ref : [B, N, N]   normalized adjacency (f32, VMEM-resident)
    x_ref : [B, N, F]   node features        (f32, VMEM-resident)
    w*_ref: GCN weights/biases               (f32, VMEM-resident)
    wh_ref: [H, TILE_N] head weight tile     (bf16, pipelined over the grid)
    bh_ref: [1, TILE_N] head bias tile       (f32)
    out_ref:[B, TILE_N] logits tile          (f32)
    """
    a = a_ref[...]                                    # [B, N, N]
    x = x_ref[...]                                    # [B, N, F]
    b, n, f = x_ref.shape
    hidden = w1_ref.shape[1]

    # --- GCN layer 1: relu(A @ X @ W1 + b1) ------------------------------- #
    h = jnp.dot(x.reshape(b * n, f), w1_ref[...],
                preferred_element_type=jnp.float32).reshape(b, n, hidden)
    h = jnp.einsum("bnm,bmh->bnh", a, h,
                   preferred_element_type=jnp.float32) + b1_ref[...]
    h = jnp.maximum(h, 0.0)

    # --- GCN layer 2: relu(A @ H1 @ W2 + b2) ------------------------------ #
    h2 = jnp.dot(h.reshape(b * n, hidden), w2_ref[...],
                 preferred_element_type=jnp.float32).reshape(b, n, hidden)
    h2 = jnp.einsum("bnm,bmh->bnh", a, h2,
                    preferred_element_type=jnp.float32) + b2_ref[...]
    h2 = jnp.maximum(h2, 0.0)

    # --- features.mean(dim=0, keepdim=True), batched -> [B, H] ------------ #
    pooled = jnp.mean(h2, axis=1)

    # --- head: Linear(features_dim, n_actions), this tile ----------------- #
    out_ref[...] = (
        jnp.dot(pooled.astype(wh_ref.dtype), wh_ref[...],
                preferred_element_type=jnp.float32)
        + bh_ref[...]
    )


# --------------------------------------------------------------------------- #
# Wrapper
# --------------------------------------------------------------------------- #
def agent_forward(a_hat, x, params, *, tile_n=1024):
    """Agent forward pass as a single Pallas kernel (grid tiled over the head).

    a_hat : [N, N] or [B, N, N]   normalized adjacency (float32)
    x     : [N, F] or [B, N, F]   node features (float32)
    params: dict with w1[F,H], b1[1,H], w2[H,H], b2[1,H], wh[H,A], bh[1,A]
    returns logits [1, A] (single graph) or [B, A] (batched).
    """
    single = (x.ndim == 2)
    if single:
        x = x[None]
        a_hat = a_hat[None]

    b, n, f_in = x.shape
    hidden = params["w1"].shape[1]
    n_actions = params["wh"].shape[1]

    # Pad the action dimension to a lane-dense multiple of the head tile.
    assert tile_n % 128 == 0
    num_tiles = pl.cdiv(n_actions, tile_n)
    n_pad = num_tiles * tile_n
    pad = n_pad - n_actions
    wh = jnp.pad(params["wh"], ((0, 0), (0, pad))).astype(jnp.bfloat16)
    bh = jnp.pad(params["bh"], ((0, 0), (0, pad))).astype(jnp.float32)

    logits_pad = pl.pallas_call(
        agent_kernel,
        out_shape=jax.ShapeDtypeStruct((b, n_pad), jnp.float32),
        grid=(num_tiles,),
        in_specs=[
            pl.BlockSpec((b, n, n), lambda j: (0, 0, 0)),        # a_hat (resident)
            pl.BlockSpec((b, n, f_in), lambda j: (0, 0, 0)),     # x     (resident)
            pl.BlockSpec((f_in, hidden), lambda j: (0, 0)),      # w1    (resident)
            pl.BlockSpec((1, hidden), lambda j: (0, 0)),         # b1
            pl.BlockSpec((hidden, hidden), lambda j: (0, 0)),    # w2
            pl.BlockSpec((1, hidden), lambda j: (0, 0)),         # b2
            pl.BlockSpec((hidden, tile_n), lambda j: (0, j)),    # wh tile (pipelined)
            pl.BlockSpec((1, tile_n), lambda j: (0, j)),         # bh tile
        ],
        out_specs=pl.BlockSpec((b, tile_n), lambda j: (0, j)),
        compiler_params=pltpu.CompilerParams(
            dimension_semantics=("parallel",)),                  # 2-TC shard on v7x
    )(a_hat, x, params["w1"], params["b1"], params["w2"], params["b2"], wh, bh)

    # Drop zero-padded logit columns (must happen before any softmax/sampling).
    return logits_pad[:, :n_actions]


# --------------------------------------------------------------------------- #
# Plain-JAX glue + reference
# --------------------------------------------------------------------------- #
def build_normalized_adjacency(edge_index, num_nodes):
    """Dense GCN-normalized adjacency  D^{-1/2} (A + I) D^{-1/2}."""
    src, dst = edge_index[0], edge_index[1]
    adj = jnp.zeros((num_nodes, num_nodes), jnp.float32)
    adj = adj.at[src, dst].set(1.0)
    adj = adj.at[dst, src].set(1.0)                       # symmetrize
    adj = adj + jnp.eye(num_nodes, dtype=jnp.float32)     # self-loops
    deg = jnp.sum(adj, axis=1)
    d_inv_sqrt = 1.0 / jnp.sqrt(deg)
    return adj * d_inv_sqrt[:, None] * d_inv_sqrt[None, :]


def init_params(key, f_in, hidden, n_actions):
    k1, k2, k3 = jax.random.split(key, 3)
    scale1 = 1.0 / jnp.sqrt(f_in)
    scale2 = 1.0 / jnp.sqrt(hidden)
    return {
        "w1": jax.random.uniform(k1, (f_in, hidden), jnp.float32, -scale1, scale1),
        "b1": jnp.zeros((1, hidden), jnp.float32),
        "w2": jax.random.uniform(k2, (hidden, hidden), jnp.float32, -scale2, scale2),
        "b2": jnp.zeros((1, hidden), jnp.float32),
        "wh": jax.random.uniform(k3, (hidden, n_actions), jnp.float32, -scale2, scale2),
        "bh": jnp.zeros((1, n_actions), jnp.float32),
    }


def agent_forward_ref(a_hat, x, params):
    """Pure-JAX reference (matches the kernel's bf16 head quantization)."""
    h = jnp.einsum("bnf,fh->bnh", x, params["w1"])
    h = jnp.einsum("bnm,bmh->bnh", a_hat, h) + params["b1"]
    h = jnp.maximum(h, 0.0)
    h2 = jnp.einsum("bnh,hk->bnk", h, params["w2"])
    h2 = jnp.einsum("bnm,bmk->bnk", a_hat, h2) + params["b2"]
    h2 = jnp.maximum(h2, 0.0)
    pooled = jnp.mean(h2, axis=1)
    wh = params["wh"].astype(jnp.bfloat16).astype(jnp.float32)
    pooled = pooled.astype(jnp.bfloat16).astype(jnp.float32)
    return pooled @ wh + params["bh"]


# --------------------------------------------------------------------------- #
# Demo
# --------------------------------------------------------------------------- #
if __name__ == "__main__":
    BATCH = 8          # graphs per kernel call (amortizes the head-weight DMA)
    N_NODES = 8        # TSP cities / graph nodes
    F_IN = 4           # node feature dim
    HIDDEN = 32        # features_dim of the extractor
    N_ACTIONS = 4845   # nn.Linear(features_dim, 4845)

    key = jax.random.PRNGKey(0)
    k_x, k_p = jax.random.split(key)

    # Deterministic node features for a batch of graphs.
    x = jax.random.normal(k_x, (BATCH, N_NODES, F_IN), jnp.float32)

    # Deterministic edge_index: a ring over the nodes plus two chords.
    src = jnp.concatenate([jnp.arange(N_NODES), jnp.array([0, 2])])
    dst = jnp.concatenate([(jnp.arange(N_NODES) + 1) % N_NODES, jnp.array([4, 6])])
    edge_index = jnp.stack([src, dst]).astype(jnp.int32)   # [2, E]

    a_single = build_normalized_adjacency(edge_index, N_NODES)
    a_hat = jnp.broadcast_to(a_single, (BATCH, N_NODES, N_NODES))

    params = init_params(k_p, F_IN, HIDDEN, N_ACTIONS)

    # Batched forward (B graphs per call).
    logits = agent_forward(a_hat, x, params)
    jax.block_until_ready(logits)
    assert logits.shape == (BATCH, N_ACTIONS)

    # Single-graph path (matches the PyTorch module's forward signature).
    logits1 = agent_forward(a_single, x[0], params)
    jax.block_until_ready(logits1)
    assert logits1.shape == (1, N_ACTIONS)

    # Numerics check against the pure-JAX reference.
    ref = agent_forward_ref(a_hat, x, params)
    max_err = float(jnp.max(jnp.abs(logits - ref)))
    assert max_err < 1e-2, f"max abs error {max_err}"

    print("KERNEL_OK")
</pallas_src>

<mosaic_0001>
module attributes {stable_mosaic.version = 11 : i64} {
  func.func @agent_kernel(%arg0: i32, %arg1: memref<8x8x8xf32, #tpu.memory_space<vmem>>, %arg2: memref<8x8x4xf32, #tpu.memory_space<vmem>>, %arg3: memref<4x32xf32, #tpu.memory_space<vmem>>, %arg4: memref<1x32xf32, #tpu.memory_space<vmem>>, %arg5: memref<32x32xf32, #tpu.memory_space<vmem>>, %arg6: memref<1x32xf32, #tpu.memory_space<vmem>>, %arg7: memref<32x1024xbf16, #tpu.memory_space<vmem>>, %arg8: memref<1x1024xf32, #tpu.memory_space<vmem>>, %arg9: memref<8x1024xf32, #tpu.memory_space<vmem>>) attributes {dimension_semantics = [#tpu.dimension_semantics<parallel>], iteration_bounds = array<i64: 5>, scalar_prefetch = 0 : i64, scratch_operands = 0 : i64, tpu.core_type = #tpu.core_type<tc>, window_params = [{pipeline_mode = #tpu.pipeline_mode<synchronous>, transform_indices = @transform_0, window_bounds = array<i64: 8, 8, 8>}, {pipeline_mode = #tpu.pipeline_mode<synchronous>, transform_indices = @transform_1, window_bounds = array<i64: 8, 8, 4>}, {pipeline_mode = #tpu.pipeline_mode<synchronous>, transform_indices = @transform_2, window_bounds = array<i64: 4, 32>}, {pipeline_mode = #tpu.pipeline_mode<synchronous>, transform_indices = @transform_3, window_bounds = array<i64: 1, 32>}, {pipeline_mode = #tpu.pipeline_mode<synchronous>, transform_indices = @transform_4, window_bounds = array<i64: 32, 32>}, {pipeline_mode = #tpu.pipeline_mode<synchronous>, transform_indices = @transform_5, window_bounds = array<i64: 1, 32>}, {transform_indices = @transform_6, window_bounds = array<i64: 32, 1024>}, {transform_indices = @transform_7, window_bounds = array<i64: 1, 1024>}, {transform_indices = @transform_8, window_bounds = array<i64: 8, 1024>}]} {
    %c0 = arith.constant 0 : index
    %c0_0 = arith.constant 0 : index
    %c0_1 = arith.constant 0 : index
    %0 = vector.load %arg1[%c0, %c0_0, %c0_1] : memref<8x8x8xf32, #tpu.memory_space<vmem>>, vector<8x8x8xf32>
    %c0_2 = arith.constant 0 : index
    %c0_3 = arith.constant 0 : index
    %c0_4 = arith.constant 0 : index
    %1 = vector.load %arg2[%c0_2, %c0_3, %c0_4] : memref<8x8x4xf32, #tpu.memory_space<vmem>>, vector<8x8x4xf32>
    %2 = vector.shape_cast %1 : vector<8x8x4xf32> to vector<64x4xf32>
    %c0_5 = arith.constant 0 : index
    %c0_6 = arith.constant 0 : index
    %3 = vector.load %arg3[%c0_5, %c0_6] : memref<4x32xf32, #tpu.memory_space<vmem>>, vector<4x32xf32>
    %cst = arith.constant dense<0.000000e+00> : vector<64x32xf32>
    %4 = tpu.matmul %2, %3, %cst {dimension_numbers = #tpu.dot_dimension_numbers<[1], [0], [0], [1], [0, 0, 1, 1], [], []>} : vector<64x4xf32>, vector<4x32xf32>, vector<64x32xf32> -> vector<64x32xf32>
    %5 = vector.shape_cast %4 : vector<64x32xf32> to vector<8x8x32xf32>
    "tpu.trace_start"() <{level = 10 : i32, message = "bnm,bmh->bnh"}> : () -> ()
    %cst_7 = arith.constant dense<0.000000e+00> : vector<8x8x32xf32>
    %6 = tpu.matmul %0, %5, %cst_7 {dimension_numbers = #tpu.dot_dimension_numbers<[2], [1], [1], [2], [0, 0, 0, 1, 1, 2], [0], [0]>} : vector<8x8x8xf32>, vector<8x8x32xf32>, vector<8x8x32xf32> -> vector<8x8x32xf32>
    "tpu.trace_stop"() : () -> ()
    %c0_8 = arith.constant 0 : index
    %c0_9 = arith.constant 0 : index
    %7 = vector.load %arg4[%c0_8, %c0_9] : memref<1x32xf32, #tpu.memory_space<vmem>>, vector<1x32xf32>
    %8 = vector.shape_cast %7 : vector<1x32xf32> to vector<1x1x32xf32>
    %9 = vector.broadcast %8 : vector<1x1x32xf32> to vector<8x8x32xf32>
    %10 = arith.addf %6, %9 : vector<8x8x32xf32>
    %cst_10 = arith.constant 0.000000e+00 : f32
    %11 = vector.broadcast %cst_10 : f32 to vector<8x8x32xf32>
    %12 = arith.maximumf %10, %11 : vector<8x8x32xf32>
    %13 = vector.shape_cast %12 : vector<8x8x32xf32> to vector<64x32xf32>
    %c0_11 = arith.constant 0 : index
    %c0_12 = arith.constant 0 : index
    %14 = vector.load %arg5[%c0_11, %c0_12] : memref<32x32xf32, #tpu.memory_space<vmem>>, vector<32x32xf32>
    %cst_13 = arith.constant dense<0.000000e+00> : vector<64x32xf32>
    %15 = tpu.matmul %13, %14, %cst_13 {dimension_numbers = #tpu.dot_dimension_numbers<[1], [0], [0], [1], [0, 0, 1, 1], [], []>} : vector<64x32xf32>, vector<32x32xf32>, vector<64x32xf32> -> vector<64x32xf32>
    %16 = vector.shape_cast %15 : vector<64x32xf32> to vector<8x8x32xf32>
    "tpu.trace_start"() <{level = 10 : i32, message = "bnm,bmh->bnh"}> : () -> ()
    %cst_14 = arith.constant dense<0.000000e+00> : vector<8x8x32xf32>
    %17 = tpu.matmul %0, %16, %cst_14 {dimension_numbers = #tpu.dot_dimension_numbers<[2], [1], [1], [2], [0, 0, 0, 1, 1, 2], [0], [0]>} : vector<8x8x8xf32>, vector<8x8x32xf32>, vector<8x8x32xf32> -> vector<8x8x32xf32>
    "tpu.trace_stop"() : () -> ()
    %c0_15 = arith.constant 0 : index
    %c0_16 = arith.constant 0 : index
    %18 = vector.load %arg6[%c0_15, %c0_16] : memref<1x32xf32, #tpu.memory_space<vmem>>, vector<1x32xf32>
    %19 = vector.shape_cast %18 : vector<1x32xf32> to vector<1x1x32xf32>
    %20 = vector.broadcast %19 : vector<1x1x32xf32> to vector<8x8x32xf32>
    %21 = arith.addf %17, %20 : vector<8x8x32xf32>
    %cst_17 = arith.constant 0.000000e+00 : f32
    %22 = vector.broadcast %cst_17 : f32 to vector<8x8x32xf32>
    %23 = arith.maximumf %21, %22 : vector<8x8x32xf32>
    %cst_18 = arith.constant dense<0.000000e+00> : vector<8x32xf32>
    %24 = vector.multi_reduction <add>, %23, %cst_18 [1] : vector<8x8x32xf32> to vector<8x32xf32>
    %cst_19 = arith.constant 8.000000e+00 : f32
    %25 = vector.broadcast %cst_19 : f32 to vector<8x32xf32>
    %26 = arith.divf %24, %25 : vector<8x32xf32>
    %27 = arith.truncf %26 : vector<8x32xf32> to vector<8x32xbf16>
    %c0_20 = arith.constant 0 : index
    %c0_21 = arith.constant 0 : index
    %28 = vector.load %arg7[%c0_20, %c0_21] : memref<32x1024xbf16, #tpu.memory_space<vmem>>, vector<32x1024xbf16>
    %cst_22 = arith.constant dense<0.000000e+00> : vector<8x1024xf32>
    %29 = tpu.matmul %27, %28, %cst_22 {dimension_numbers = #tpu.dot_dimension_numbers<[1], [0], [0], [1], [0, 0, 1, 1], [], []>} : vector<8x32xbf16>, vector<32x1024xbf16>, vector<8x1024xf32> -> vector<8x1024xf32>
    %c0_23 = arith.constant 0 : index
    %c0_24 = arith.constant 0 : index
    %30 = vector.load %arg8[%c0_23, %c0_24] : memref<1x1024xf32, #tpu.memory_space<vmem>>, vector<1x1024xf32>
    %31 = vector.broadcast %30 : vector<1x1024xf32> to vector<8x1024xf32>
    %32 = arith.addf %29, %31 : vector<8x1024xf32>
    %c0_25 = arith.constant 0 : index
    %c0_26 = arith.constant 0 : index
    %33 = vector.load %arg9[%c0_25, %c0_26] : memref<8x1024xf32, #tpu.memory_space<vmem>>, vector<8x1024xf32>
    tpu.vector_store %arg9[%c0_25, %c0_26], %32 {strides = array<i32>} : memref<8x1024xf32, #tpu.memory_space<vmem>>, vector<8x1024xf32>,
    return
  }
  func.func @transform_0(%arg0: i32) -> (i32, i32, i32) {
    %c0_i32 = arith.constant 0 : i32
    %c0_i32_0 = arith.constant 0 : i32
    %c0_i32_1 = arith.constant 0 : i32
    %c0_i32_2 = arith.constant 0 : i32
    return %c0_i32, %c0_i32_0, %c0_i32_1 : i32, i32, i32
  }
  func.func @transform_1(%arg0: i32) -> (i32, i32, i32) {
    %c0_i32 = arith.constant 0 : i32
    %c0_i32_0 = arith.constant 0 : i32
    %c0_i32_1 = arith.constant 0 : i32
    %c0_i32_2 = arith.constant 0 : i32
    return %c0_i32, %c0_i32_0, %c0_i32_1 : i32, i32, i32
  }
  func.func @transform_2(%arg0: i32) -> (i32, i32) {
    %c0_i32 = arith.constant 0 : i32
    %c0_i32_0 = arith.constant 0 : i32
    %c0_i32_1 = arith.constant 0 : i32
    return %c0_i32, %c0_i32_0 : i32, i32
  }
  func.func @transform_3(%arg0: i32) -> (i32, i32) {
    %c0_i32 = arith.constant 0 : i32
    %c0_i32_0 = arith.constant 0 : i32
    %c0_i32_1 = arith.constant 0 : i32
    return %c0_i32, %c0_i32_0 : i32, i32
  }
  func.func @transform_4(%arg0: i32) -> (i32, i32) {
    %c0_i32 = arith.constant 0 : i32
    %c0_i32_0 = arith.constant 0 : i32
    %c0_i32_1 = arith.constant 0 : i32
    return %c0_i32, %c0_i32_0 : i32, i32
  }
  func.func @transform_5(%arg0: i32) -> (i32, i32) {
    %c0_i32 = arith.constant 0 : i32
    %c0_i32_0 = arith.constant 0 : i32
    %c0_i32_1 = arith.constant 0 : i32
    return %c0_i32, %c0_i32_0 : i32, i32
  }
  func.func @transform_6(%arg0: i32) -> (i32, i32) {
    %c0_i32 = arith.constant 0 : i32
    %c0_i32_0 = arith.constant 0 : i32
    return %c0_i32, %arg0 : i32, i32
  }
  func.func @transform_7(%arg0: i32) -> (i32, i32) {
    %c0_i32 = arith.constant 0 : i32
    %c0_i32_0 = arith.constant 0 : i32
    return %c0_i32, %arg0 : i32, i32
  }
  func.func @transform_8(%arg0: i32) -> (i32, i32) {
    %c0_i32 = arith.constant 0 : i32
    %c0_i32_0 = arith.constant 0 : i32
    return %c0_i32, %arg0 : i32, i32
  }
}

</mosaic_0001>

<bundles_post_ra>
// kernel: tpu_custom_call.1
= control target key start
LH: loop header
LB: loop body
LE: loop exit
PB: predicated region body
PF: predicated region fallthrough
CT: control target
= control target key end

     0   :  { %s3366_s0 = inlined_call_operand.vmem [shape: f32[8,8,8], index: 0, kind: input, shape index: {}]   ;;  %s3367_s1 = inlined_call_operand.vmem [shape: f32[8,8,4], index: 1, kind: input, shape index: {}]   ;;  %s3368_s2 = inlined_call_operand.hbm [shape: f32[4,32], index: 2, kind: input, shape index: {}]   ;;  %s3369_s3 = inlined_call_operand.vmem [shape: f32[1,32], index: 3, kind: input, shape index: {}]   ;;  %s3370_s4 = inlined_call_operand.hbm [shape: f32[32,32], index: 4, kind: input, shape index: {}]   ;;  %s3371_s5 = inlined_call_operand.vmem [shape: f32[1,32], index: 5, kind: input, shape index: {}]   ;;  %s3372_s6 = inlined_call_operand.hbm [shape: bf16[32,5120], index: 6, kind: input, shape index: {}]   ;;  %s3373_s7 = inlined_call_operand.vmem [shape: f32[1,5120], index: 7, kind: input, shape index: {}]   ;;  %s3374_s8 = inlined_call_operand.hbm [shape: f32[8,5120], index: 8, kind: output, shape index: {}]  }
   0x1   :  { %3384 = sst [smem:[#allocation17_spill]] %s3368_s2 }
   0x2   :  { %13 = vsyncpa [#allocation3], 0 }
   0x3   :  { %14 = vsyncpa [#allocation6], 0 }
   0x4   :  { %15 = vsyncpa [#allocation4], 0 }
   0x5   :  { %17 = vsyncpa [#allocation4 + $0x1], 0  ;;  %s2906_s27 = smov 0   ;;  %s2908_s28 = smov 0  }
   0x6   :  { %s2910_s29 = smov 0   ;;  %s2912_s30 = smov 0  }
   0x7 LB: > { %3385 = sst [smem:[#allocation13_spill]] %s2835_s27  ;;  %s2927_s9 = sadd.s32 4294967295, %s2847_s30   ;;  %s2847_s30 = sphi %s2912_s30, %s3408_s30   ;;  %s2843_s29 = sphi %s2910_s29, %s3412_s29   ;;  %s2839_s28 = sphi %s2908_s28, %s3411_s28   ;;  %s2835_s27 = sphi %s2906_s27, %s3410_s27  }
   0x8   : > { %s2361_s10 = sadd.s32 4294967294, %s2847_s30   ;;  %s2931_s11 = sadd.s32 1, %s2847_s30  }
   0x9   : > { %3386 = sst [smem:[#allocation14_spill]] %s2931_s11  ;;  %s156_s12 = sadd.s32 1, %s2843_s29 }
   0xa   : > { %s153_s13 = ssub.s32 %s2847_s30, %s2931_s11  ;;  %p163_p0 = scmp.ne.s32.totalorder %s2843_s29, %s2839_s28 }
   0xb   : > { %p154_p1 = scmp.eq.s32.totalorder %s153_s13, 0  ;;  %p164_p2 = scmp.eq.s32.totalorder %s2847_s30, 0 }
   0xc   : > { %p169_p3 = scmp.ne.s32.totalorder %s2839_s28, %s2835_s27  ;;  %p3375_p4 = scmp.eq.s32.totalorder %s2927_s9, 0 }
   0xd   : > { %s2943_s14 = scalar_select %p154_p1, %s2843_s29, %s156_s12  }
   0xe   : > { %p2945_p5 = por %p164_p2, %p163_p0  ;;  %p2951_p6 = por %p3375_p4, %p169_p3 }
   0xf   : > { %3387 = sst [smem:[#allocation15_spill]] %s2943_s14  ;;  %p219_p7 = scmp.eq.s32.totalorder %s2927_s9, 4 }
  0x10   : > { %s3389_s16 = scalar_select %p2951_p6, 1, 0 }
  0x11   : > { %p225_p8 = scmp.eq.s32.totalorder %s2361_s10, 4  ;;  %p2362_p9 = scmp.ge.s32.totalorder %s2847_s30, 1 }
  0x12   : > { %p232_p10 = scmp.lt.s32.totalorder %s2847_s30, 6  ;;  %p2958_p11 = por %p219_p7, %p163_p0 }
  0x13   : > { %p2962_p12 = por %p225_p8, %p169_p3  ;;  %s2849_s20 = smov [#allocation2]  }
  0x14   : > { %s3390_s17 = scalar_select %p2958_p11, 1, 0 }
  0x15   : > { %s3391_s18 = scalar_select %p2962_p12, 1, 0 }
  0x16   : > { %p2966_p13 = pnand %p2362_p9, %p232_p10  ;;  %s251_s21 = sshll.u32 %s2849_s20, 4  ;;  %s252_s21 = int_to_ptr.vmem [resolvable:$true] %s251_s21 }
  0x17   : > { %3392 = sst [smem:[#allocation16_spill]] %s3391_s18  ;;  %p2641_p2 = scmp.lt.s32.totalorder %s2847_s30, 5 }
  0x18   : > { %s3393_s19 = scalar_select %p2966_p13, 1, 0 }
  0x19   : > { %p2624_p1 = pneg %p2966_p13  ;;  %p2981_p3 = pnand %p2641_p2, %p2945_p5 }
  0x1a   : > { %s2850_s24 = smov [#allocation5]   ;;  %s3396_s2 = sld [smem:[#allocation17_spill]] }
  0x1b   : > { %p2975_p0 = pnand %p2624_p1, %p3375_p4  ;;  %s264_s25 = sshll.u32 %s2850_s24, 4  ;;  %s2985_s25 = int_to_ptr.vmem [resolvable:$true] %s264_s25 }
  0x1c   : > { %s3395_s23 = scalar_select %p2981_p3, 1, 0 }
  0x1d   : > { %p2689_p8 = pneg %p2975_p0 }
  0x20   : > { %s2687_s12 = scalar_lea.hbm %s3396_s2, 64 }
  0x21   : > { %p2688_p7 = scmp.ne.s32.totalorder %s3396_s2, %s2687_s12  ;;  %p2694_p10 = scmp.lt.u32.totalorder %s2687_s12, %s3396_s2 }
  0x23   : > { %p2690_p5 = pnand %p2689_p8, %p2688_p7 }
  0x25   : > { %p2691_p9 = pneg %p2690_p5 }
  0x27   : > { %p2696_p1 = pnand %p2694_p10, %p2691_p9 }
  0x29   : > { %2699 = shalt.err (!%p2696_p1)
}
  0x2a   : > { %s2700_s24 = scalar_lea.vmem %s252_s21, 64  ;;  %p2708_p11 = scmp.lt.s32.totalorder %s252_s21, %s252_s21 }
  0x2b   : > { %p2701_p2 = scmp.ne.s32.totalorder %s252_s21, %s2700_s24  ;;  %p2709_p6 = scmp.lt.s32.totalorder %s2700_s24, %s2700_s24 }
  0x2d   : > { %p2703_p4 = pnand %p2701_p2, %p2689_p8  ;;  %p2710_p13 = por %p2709_p6, %p2708_p11 }
  0x2f   : > { %p2704_p12 = pneg %p2703_p4 }
  0x31   : > { %p2711_p3 = pnand %p2710_p13, %p2704_p12 }
  0x33   : > { %2714 = shalt.err (!%p2711_p3)
}
  0x34   : > { %2627 = dma.hbm_to_vmem [thread:$0]  (!%p2975_p0), %s3396_s2, 64, %s252_s21, [#allocation3]  }
  0x35   : > { %s281_s14 = sand.u32 1, %s2847_s30   ;;  %s2715_s20 = scalar_lea.hbm %s3370_s4, 512 }
  0x36   : > { %p2716_p4 = scmp.ne.s32.totalorder %s3370_s4, %s2715_s20  ;;  %p2722_p12 = scmp.lt.u32.totalorder %s2715_s20, %s3370_s4 }
  0x38   : > { %p2718_p6 = pnand %p2716_p4, %p2689_p8 }
  0x3a   : > { %p2719_p11 = pneg %p2718_p6 }
  0x3c   : > { %p2724_p13 = pnand %p2722_p12, %p2719_p11 }
  0x3e   : > { %2727 = shalt.err (!%p2724_p13)
}
  0x3f   : > { %s2728_s21 = scalar_lea.vmem %s2985_s25, 512  ;;  %p2736_p9 = scmp.lt.s32.totalorder %s2985_s25, %s2985_s25 }
  0x40   : > { %p2729_p3 = scmp.ne.s32.totalorder %s2985_s25, %s2728_s21  ;;  %p2737_p10 = scmp.lt.s32.totalorder %s2728_s21, %s2728_s21 }
  0x42   : > { %p2731_p7 = pnand %p2729_p3, %p2689_p8  ;;  %p2738_p1 = por %p2737_p10, %p2736_p9 }
  0x44   : > { %p2732_p5 = pneg %p2731_p7 }
  0x46   : > { %p2739_p2 = pnand %p2738_p1, %p2732_p5 }
  0x48   : > { %2742 = shalt.err (!%p2739_p2)
}
  0x49   : > { %s2851_s11 = smov 128   ;;  %s2852_s18 = smov 8  }
  0x4a   : > { %2630 = dma.hbm_to_vmem [thread:$0]  (!%p2975_p0), %s3370_s4, 512, %s2985_s25, [#allocation6], %s2851_s11, %s2851_s11, %s2852_s18  }
  0x4b   : > { %s283_s12 = sand.u32 1, %s2843_s29   ;;  %s2435_s20 = sshll.u32 %s2847_s30, 9 }
  0x4c   : > { %s2366_s13 = sshll.u32 %s283_s12, 7  ;;  %s3040_s21 = scalar_lea.hbm %s3372_s6, %s2435_s20 }
  0x4d   : > { %s285_s2 = scalar_lea.vmem [#allocation7], %s2366_s13  ;;  %s3044_s22 = scalar_lea.sflag [#allocation3], %s281_s14 }
  0x4e   : > { %s292_s27 = sshll.u32 %s285_s2, 4  ;;  %s2743_s26 = scalar_lea.hbm %s3040_s21, 2048  ;;  %s3042_s27 = int_to_ptr.vmem [resolvable:$true] %s292_s27 }
  0x4f   : > { %p2744_p0 = scmp.ne.s32.totalorder %s3040_s21, %s2743_s26  ;;  %p3397_p8 = scmp.ne.s32.totalorder %s3395_s23, 0 }
  0x50   : > { %s2748_s18 = scalar_lea.hbm %s3372_s6, 10240  ;;  %p2749_p12 = scmp.lt.u32.totalorder %s3040_s21, %s3372_s6 }
  0x51   : > { %p2745_p4 = pneg %p3397_p8  ;;  %p2750_p13 = scmp.lt.u32.totalorder %s2748_s18, %s2743_s26 }
  0x52   : > { %p2752_p7 = scmp.lt.u32.totalorder %s2743_s26, %s3040_s21 }
  0x53   : > { %p2746_p6 = pnand %p2745_p4, %p2744_p0  ;;  %p2751_p3 = por %p2750_p13, %p2749_p12 }
  0x55   : > { %p2747_p11 = pneg %p2746_p6  ;;  %p2753_p5 = por %p2752_p7, %p2751_p3 }
  0x57   : > { %p2754_p9 = pnand %p2753_p5, %p2747_p11 }
  0x59   : > { %2757 = shalt.err (!%p2754_p9)
}
  0x5a   : > { %s2758_s2 = scalar_lea.vmem %s3042_s27, 2048  ;;  %s2853_s14 = smov [#allocation7]  }
  0x5b   : > { %p2759_p10 = scmp.ne.s32.totalorder %s3042_s27, %s2758_s2  ;;  %s2763_s13 = sshll.u32 %s2853_s14, 4  ;;  %s2764_s13 = int_to_ptr.vmem [resolvable:$false] %s2763_s13 }
  0x5c   : > { %s2765_s20 = scalar_lea.vmem %s2764_s13, 4096  ;;  %p2766_p0 = scmp.lt.s32.totalorder %s3042_s27, %s2764_s13 }
  0x5d   : > { %p2761_p1 = pnand %p2759_p10, %p2745_p4  ;;  %p2767_p6 = scmp.lt.s32.totalorder %s2765_s20, %s2758_s2 }
  0x5f   : > { %p2762_p2 = pneg %p2761_p1  ;;  %p2768_p12 = por %p2767_p6, %p2766_p0 }
  0x61   : > { %p2769_p13 = pnand %p2768_p12, %p2762_p2 }
  0x63   : > { %2772 = shalt.err (!%p2769_p13)
}
  0x64   : > { %s2854_s15 = smov 2560   ;;  %s2855_s24 = smov 512  }
  0x65   : > { %s2856_s26 = smov 32   ;;  %p3398_p4 = scmp.ne.s32.totalorder %s3393_s19, 0 }
  0x66   : > { %2634 = dma.hbm_to_vmem [thread:$0]  (!%p3397_p8), %s3040_s21, 2048, %s3042_s27, %s3044_s22, %s2854_s15, %s2855_s24, %s2856_s26  }
  0x67   : > { %312 = sbr.rel (%p3398_p4) target bundleno = 1267 (0x4f3), region = 52  ;;  %p3399_p11 = scmp.eq.s32.totalorder (!%p3398_p4), %s2927_s9, 0 }
  0x6e   : > { %2818 = dma.done.wait (%p3399_p11), [#allocation3], 64   ;;  %p3400_p3 = pmov %p3399_p11 }
  0x70   : > { %2820 = vsyncadd (%p3400_p3), [#allocation3], 4294967232  ;;  %p3401_p7 = pmov %p3400_p3 }
  0x71   : > { %p3402_p5 = pmov %p3400_p3 }
  0x72   : > { %2822 = dma.done.wait (%p3401_p7), [#allocation6], 512  }
  0x73   : > { %2824 = vsyncadd (%p3402_p5), [#allocation6], 4294966784  ;;  %s322_s23 = sand.u32 1, %s2927_s9   ;;  %s3084_s27 = sand.u32 1, %s2839_s28  }
  0x74   : > { %s2372_s19 = sshll.u32 %s3084_s27, 7  ;;  %s323_s21 = scalar_lea.sflag [#allocation3], %s322_s23 }
  0x75   : > { %s3087_s22 = scalar_lea.vmem [#allocation7], %s2372_s19  ;;  %p3403_p8 = scmp.ne.s32.totalorder %s3389_s16, 0 }
  0x77   : > { %2826 = dma.done.wait (%p3403_p8), %s323_s21, 2048  }
  0x78   : > { %2828 = vsyncadd (%p3403_p8), %s323_s21, 4294965248  ;;  %vm413_vm0 = vcmask 1043456   ;;  %vm388_vm1 = vcmask 31744   ;;  %v387_v0 = vld [vmem:[#allocation2] sm:$0xf]  ;;  %v380_v2 = vld [vmem:[%s3367_s1 + $0x8] sm:$0xff] }
  0x79   : > { %v379_v1 = vld [vmem:[%s3367_s1] sm:$0xff]  ;;  %2490 = vmatprep.subr.msk.mxu0 %vm413_vm0, %v387_v0  ;;  %v381_v3 = vld [vmem:[%s3367_s1 + $0x10] sm:$0xff]  ;;  %v382_v4 = vld [vmem:[%s3367_s1 + $0x18] sm:$0xff]  ;;  %v2857_v9 = vmov 0.0   ;;  %vm2858_vm2 = vmmov 0   ;;  %vm529_vm3 = vcmask 64512  }
  0x7a   : > { %2492 = vmatprep.mubr.msk.f32.mxu0 %vm388_vm1, %v379_v1  ;;  %2491 = vmatpush3.msk.msra.mxu0 %vm413_vm0, %v387_v0  ;;  %v383_v5 = vld [vmem:[%s3367_s1 + $0x20] sm:$0xff]  ;;  %v384_v6 = vld [vmem:[%s3367_s1 + $0x28] sm:$0xff]  ;;  %v385_v7 = vld [vmem:[%s3367_s1 + $0x30] sm:$0xff]  ;;  %vm1126_vm4 = vcmask 261120   ;;  %vm1978_vm5 = vcmask 1041409   ;;  %vm1980_vm6 = vcmask 1042434  }
  0x7b   : > { %2493 = vmatmul.mubr.msk.f32.vlgmr.msra.gmra.mrb[0].mxu0 %vm388_vm1, %v380_v2  ;;  %v386_v8 = vld [vmem:[%s3367_s1 + $0x38] sm:$0xff]  ;;  %2504 = vmatprep.subr.mxu1 %v2857_v9  ;;  %v3134_v11 = vld [vmem:[%s3366_s0] sm:$0xff]  ;;  %v3144_v14 = vld [vmem:[%s3366_s0 + $0x8] sm:$0xff]  ;;  %vm1982_vm7 = vcmask 1043459   ;;  %vm1984_vm8 = vcmask 1044484   ;;  %vm1986_vm9 = vcmask 1045509  }
  0x7c   : > { %2495 = vmatprep.mubr.msk.f32.mxu0 %vm388_vm1, %v381_v3  ;;  %2524 = vmatprep.subr.mxu0 %v2857_v9  ;;  %v3154_v16 = vld [vmem:[%s3366_s0 + $0x10] sm:$0xff]  ;;  %v3159_v18 = vld [vmem:[%s3366_s0 + $0x20] sm:$0xff]  ;;  %v3171_v20 = vld [vmem:[%s3366_s0 + $0x18] sm:$0xff]  ;;  %vm1988_vm10 = vcmask 1046534   ;;  %vm1990_vm11 = vcmask 1047559   ;;  %s2373_s14 = sshll.u32 %s3084_s27, 6 }
  0x7d   : > { %2506 = vmatprep.mubr.msk.f32.mxu1 %vm2858_vm2, %v2857_v9  ;;  %v3176_v22 = vld [vmem:[%s3366_s0 + $0x30] sm:$0xff]  ;;  %v3191_v24 = vld [vmem:[%s3366_s0 + $0x28] sm:$0xff]  ;;  %v3201_v25 = vld [vmem:[%s3366_s0 + $0x38] sm:$0xff]  ;;  %s362_s13 = scalar_lea.vmem [#allocation8], %s2373_s14  ;;  %s2436_s20 = sshll.u32 %s2927_s9, 10 }
  0x7e   : > { %v1122_v26 = vld [vmem:[#allocation5] sm:$0xff]  ;;  %v1123_v27 = vld [vmem:[#allocation5 + $0x8] sm:$0xff]  ;;  %v1124_v29 = vld [vmem:[#allocation5 + $0x10] sm:$0xff]  ;;  %s2263_s15 = sshll.u32 %s362_s13, 4  ;;  %s3323_s23 = scalar_lea.hbm %s3374_s8, %s2436_s20  ;;  %s3325_s15 = int_to_ptr.vmem [resolvable:$true] %s2263_s15 }
  0x7f   : > { %2496 = vmatmul.mubr.msk.f32.gmra.mrb[2].mxu0 %vm388_vm1, %v382_v4  ;;  %v2604_v28 = vpack.c.bf16 %v1123_v27, %v1122_v26  ;;  %v1125_v30 = vld [vmem:[#allocation5 + $0x18] sm:$0xff]  ;;  %v3267_v26 = vld [vmem:[%s3087_s22 + $0x10] sm:$0xff]  ;;  %s2773_s19 = scalar_lea.vmem %s3325_s15, 1024  ;;  %p3404_p1 = scmp.ne.s32.totalorder %s3390_s17, 0 }
  0x80   : > { %2498 = vmatprep.mubr.msk.f32.mxu0 %vm388_vm1, %v383_v5  ;;  %v2608_v31 = vpack.c.bf16 %v1125_v30, %v1124_v29  ;;  %v2384_v32 = vld [vmem:[%s3369_s3] ss:$0 sm:$0xff]  ;;  %v3270_v27 = vld [vmem:[%s3087_s22 + $0x30] sm:$0xff]  ;;  %p2774_p10 = scmp.ne.s32.totalorder %s3325_s15, %s2773_s19  ;;  %s2860_s21 = smov [#allocation8]  }
  0x81   : > { %v2414_v29 = vcombine.low %v3267_v26, %v3270_v27  ;;  %v2415_v30 = vcombine.high %v3267_v26, %v3270_v27  ;;  %v1922_v26 = vlaneseq  ;;  %s2777_s25 = sshll.u32 %s2860_s21, 4  ;;  %s2778_s25 = int_to_ptr.vmem [resolvable:$false] %s2777_s25 }
  0x82   : > { %p2775_p2 = pnand %p2774_p10, %p3404_p1  ;;  %s2779_s11 = scalar_lea.vmem %s2778_s25, 2048 }
  0x83   : > { %2499 = vmatmul.mubr.msk.f32.gmra.mrb[4].mxu0 %vm388_vm1, %v384_v6  ;;  %v1923_v27 = vshrl.u32 %v1922_v26, 7  ;;  %p2780_p6 = scmp.lt.s32.totalorder %s3325_s15, %s2778_s25  ;;  %p2781_p12 = scmp.lt.s32.totalorder %s2779_s11, %s2773_s19 }
  0x84   : > { %2501 = vmatprep.mubr.msk.f32.mxu0 %vm388_vm1, %v385_v7  ;;  %p2776_p0 = pneg %p2775_p2 }
  0x85   : > { %p2782_p13 = por %p2781_p12, %p2780_p6 }
  0x87   : > { %2502 = vmatmul.mubr.msk.f32.gmra.mrb[6].mxu0 %vm388_vm1, %v386_v8  ;;  %p2783_p4 = pnand %p2782_p13, %p2776_p0 }
  0x88   : > { %2526 = vmatprep.mubr.msk.f32.mxu0 %vm2858_vm2, %v2857_v9 }
 0x14e   : > { %v2494_v10 = vpop.f32.mrb[0].mxu0 }
 0x14f   : > { %v483_v12 = vpop.f32.mrb[1].mxu0 }
 0x150   : > { %2505 = vmatpush3.msra.mxu1 %v483_v12  ;;  %v1905_v12 = vld [vmem:[%s3087_s22 + $0x8] sm:$0xff] }
 0x151   : > { %2507 = vmatmul.mubr.msk.f32.vlgmr.msra.gmra.mrb[0].mxu1 %vm529_vm3, %v3134_v11  ;;  %2509 = vmatprep.subr.mxu1 %v2857_v9 }
 0x152   : > { %2510 = vmatpush3.msra.mxu1 %v2494_v10  ;;  %2511 = vmatprep.mubr.msk.f32.mxu1 %vm2858_vm2, %v2857_v9  ;;  %v2497_v13 = vpop.f32.mrb[2].mxu0  ;;  %v1904_v10 = vld [vmem:[%s3087_s22] sm:$0xff] }
 0x153   : > { %v493_v15 = vpop.f32.mrb[3].mxu0  ;;  %2514 = vmatprep.subr.mxu1 %v2857_v9 }
 0x155   : > { %2512 = vmatmul.mubr.msk.f32.vlgmr.msra.gmra.mrb[2].mxu1 %vm529_vm3, %v3144_v14 }
 0x156   : > { %2515 = vmatpush3.msra.mxu1 %v493_v15  ;;  %2516 = vmatprep.mubr.msk.f32.mxu1 %vm2858_vm2, %v2857_v9  ;;  %v2500_v17 = vpop.f32.mrb[4].mxu0 }
 0x157   : > { %2519 = vmatprep.subr.mxu1 %v2857_v9  ;;  %v503_v19 = vpop.f32.mrb[5].mxu0 }
 0x158   : > { %2525 = vmatpush3.msra.mxu0 %v503_v19  ;;  %v1916_v19 = vld [vmem:[%s3087_s22 + $0x60] sm:$0xff] }
 0x159   : > { %2517 = vmatmul.mubr.msk.f32.vlgmr.msra.gmra.mrb[4].mxu1 %vm529_vm3, %v3154_v16  ;;  %2527 = vmatmul.mubr.msk.f32.vlgmr.msra.gmra.mrb[8].mxu0 %vm529_vm3, %v3159_v18 }
 0x15a   : > { %2520 = vmatpush3.msra.mxu1 %v2497_v13  ;;  %2521 = vmatprep.mubr.msk.f32.mxu1 %vm2858_vm2, %v2857_v9  ;;  %v2503_v21 = vpop.f32.mrb[6].mxu0 }
 0x15b   : > { %2529 = vmatprep.subr.mxu1 %v2857_v9  ;;  %v513_v23 = vpop.f32.mrb[7].mxu0  ;;  %2534 = vmatprep.subr.mxu0 %v2857_v9 }
 0x15c   : > { %2535 = vmatpush3.msra.mxu0 %v513_v23  ;;  %2536 = vmatprep.mubr.msk.f32.mxu0 %vm2858_vm2, %v2857_v9 }
 0x15d   : > { %2522 = vmatmul.mubr.msk.f32.vlgmr.msra.gmra.mrb[6].mxu1 %vm529_vm3, %v3171_v20  ;;  %2537 = vmatmul.mubr.msk.f32.vlgmr.msra.gmra.mrb[10].mxu0 %vm529_vm3, %v3176_v22 }
 0x15e   : > { %2530 = vmatpush3.msra.mxu1 %v2500_v17  ;;  %2531 = vmatprep.mubr.msk.f32.mxu1 %vm2858_vm2, %v2857_v9 }
 0x15f   : > { %2539 = vmatprep.subr.mxu1 %v2857_v9  ;;  %2605 = vmatprep.subr.bf16.mxu0 %v2604_v28 }
 0x160   : > { %2607 = vmatpush3.bf16.msra.mxu0 %v2604_v28  ;;  %v3273_v28 = vld [vmem:[%s3087_s22 + $0x18] sm:$0xff] }
 0x161   : > { %2532 = vmatmul.mubr.msk.f32.vlgmr.msra.gmra.mrb[8].mxu1 %vm529_vm3, %v3191_v24  ;;  %2609 = vmatprep.subr.bf16.mxu0 %v2608_v31 }
 0x162   : > { %2540 = vmatpush3.msra.mxu1 %v2503_v21  ;;  %2541 = vmatprep.mubr.msk.f32.mxu1 %vm2858_vm2, %v2857_v9 }
 0x163   : > { %2564 = vmatprep.subr.mxu1 %v2857_v9 }
 0x164   : > { %2611 = vmatpush3.bf16.msra.mxu0 %v2608_v31  ;;  %v3280_v31 = vld [vmem:[%s3087_s22 + $0x38] sm:$0xff] }
 0x165   : > { %2542 = vmatmul.mubr.msk.f32.vlgmr.msra.gmra.mrb[10].mxu1 %vm529_vm3, %v3201_v25  ;;  %2589 = vmatprep.subr.mxu0 %v2857_v9 }
 0x166   : > { %2566 = vmatprep.mubr.msk.f32.mxu1 %vm2858_vm2, %v2857_v9 }
 0x224   : > { %v599_v33 = vpop.f32.mrb[0].mxu1 }
 0x225   : > { %v600_v34 = vadd.f32 %v2384_v32, %v599_v33  ;;  %v2508_v35 = vpop.f32.mrb[1].mxu1  ;;  %v2417_v33 = vcombine.high %v3273_v28, %v3280_v31 }
 0x227   : > { %v1114_v36 = vmax.f32 %v600_v34, 0.0  ;;  %v2401_v34 = vld [vmem:[%s3371_s5] ss:$0 sm:$0xff] }
 0x228   : > { %v672_v37 = vpop.f32.mrb[2].mxu1 }
 0x229   : > { %v673_v38 = vadd.f32 %v2384_v32, %v672_v37  ;;  %v2513_v39 = vpop.f32.mrb[3].mxu1  ;;  %2552 = vmatprep.mubr.msk.f32.mxu0 %vm1126_vm4, %v1114_v36 }
 0x22b   : > { %v1115_v40 = vmax.f32 %v673_v38, 0.0 }
 0x22c   : > { %v745_v41 = vpop.f32.mrb[4].mxu1  ;;  %v891_v42 = vpop.f32.mrb[8].mxu0 }
 0x22d   : > { %v746_v43 = vadd.f32 %v2384_v32, %v745_v41  ;;  %v2518_v44 = vpop.f32.mrb[5].mxu1  ;;  %2553 = vmatmul.mubr.msk.f32.vlgmr.msra.gmra.mrb[12].mxu0 %vm1126_vm4, %v1115_v40  ;;  %v2528_v45 = vpop.f32.mrb[9].mxu0  ;;  %v892_v46 = vadd.f32 %v2384_v32, %v891_v42 }
 0x22f   : > { %v1116_v47 = vmax.f32 %v746_v43, 0.0  ;;  %v1118_v53 = vmax.f32 %v892_v46, 0.0 }
 0x230   : > { %v818_v48 = vpop.f32.mrb[6].mxu1  ;;  %v1037_v49 = vpop.f32.mrb[10].mxu0 }
 0x231   : > { %v819_v50 = vadd.f32 %v2384_v32, %v818_v48  ;;  %v2523_v51 = vpop.f32.mrb[7].mxu1  ;;  %2555 = vmatprep.mubr.msk.f32.mxu0 %vm1126_vm4, %v1116_v47  ;;  %v2538_v52 = vpop.f32.mrb[11].mxu0  ;;  %v1038_v54 = vadd.f32 %v2384_v32, %v1037_v49 }
 0x233   : > { %v1117_v55 = vmax.f32 %v819_v50, 0.0  ;;  %v1120_v59 = vmax.f32 %v1038_v54, 0.0 }
 0x234   : > { %v964_v56 = vpop.f32.mrb[8].mxu1 }
 0x235   : > { %v965_v57 = vadd.f32 %v2384_v32, %v964_v56  ;;  %v2533_v58 = vpop.f32.mrb[9].mxu1  ;;  %2556 = vmatmul.mubr.msk.f32.gmra.mrb[14].mxu0 %vm1126_vm4, %v1117_v55 }
 0x236   : > { %2558 = vmatprep.mubr.msk.f32.mxu0 %vm1126_vm4, %v1118_v53 }
 0x237   : > { %v1119_v60 = vmax.f32 %v965_v57, 0.0 }
 0x238   : > { %v1110_v61 = vpop.f32.mrb[10].mxu1 }
 0x239   : > { %2559 = vmatmul.mubr.msk.f32.gmra.mrb[16].mxu0 %vm1126_vm4, %v1119_v60  ;;  %v1111_v62 = vadd.f32 %v2384_v32, %v1110_v61  ;;  %v2543_v63 = vpop.f32.mrb[11].mxu1  ;;  %v2416_v32 = vcombine.low %v3273_v28, %v3280_v31  ;;  %v1924_v28 = vsub.s32 0, %v1923_v27 }
 0x23a   : > { %2561 = vmatprep.mubr.msk.f32.mxu0 %vm1126_vm4, %v1120_v59 }
 0x23b   : > { %v1121_v0 = vmax.f32 %v1111_v62, 0.0 }
 0x23d   : > { %2562 = vmatmul.mubr.msk.f32.gmra.mrb[18].mxu0 %vm1126_vm4, %v1121_v0 }
 0x23e   : > { %2591 = vmatprep.mubr.msk.f32.mxu0 %vm2858_vm2, %v2857_v9 }
 0x300   : > { %v2554_v1 = vpop.f32.mrb[12].mxu0 }
 0x301   : > { %v1217_v2 = vpop.f32.mrb[13].mxu0 }
 0x302   : > { %2565 = vmatpush3.msra.mxu1 %v1217_v2 }
 0x303   : > { %2567 = vmatmul.mubr.msk.f32.vlgmr.msra.gmra.mrb[12].mxu1 %vm529_vm3, %v3134_v11  ;;  %2569 = vmatprep.subr.mxu1 %v2857_v9  ;;  %v1908_v11 = vld [vmem:[%s3087_s22 + $0x20] sm:$0xff] }
 0x304   : > { %2570 = vmatpush3.msra.mxu1 %v2554_v1  ;;  %2571 = vmatprep.mubr.msk.f32.mxu1 %vm2858_vm2, %v2857_v9  ;;  %v2411_v13 = vcombine.high %v1904_v10, %v1908_v11  ;;  %v2410_v15 = vcombine.low %v1904_v10, %v1908_v11 }
 0x305   : > { %2574 = vmatprep.subr.mxu1 %v2857_v9 }
 0x307   : > { %2572 = vmatmul.mubr.msk.f32.vlgmr.msra.gmra.mrb[14].mxu1 %vm529_vm3, %v3144_v14  ;;  %v1909_v14 = vld [vmem:[%s3087_s22 + $0x28] sm:$0xff] }
 0x308   : > { %v2557_v3 = vpop.f32.mrb[14].mxu0  ;;  %2576 = vmatprep.mubr.msk.f32.mxu1 %vm2858_vm2, %v2857_v9  ;;  %v2413_v17 = vcombine.high %v1905_v12, %v1909_v14 }
 0x309   : > { %v1227_v4 = vpop.f32.mrb[15].mxu0 }
 0x30a   : > { %2575 = vmatpush3.msra.mxu1 %v1227_v4 }
 0x30b   : > { %2577 = vmatmul.mubr.msk.f32.vlgmr.msra.gmra.mrb[16].mxu1 %vm529_vm3, %v3154_v16  ;;  %2579 = vmatprep.subr.mxu1 %v2857_v9  ;;  %v2412_v16 = vcombine.low %v1905_v12, %v1909_v14 }
 0x30c   : > { %v2560_v5 = vpop.f32.mrb[16].mxu0  ;;  %2580 = vmatpush3.msra.mxu1 %v2557_v3  ;;  %2581 = vmatprep.mubr.msk.f32.mxu1 %vm2858_vm2, %v2857_v9 }
 0x30d   : > { %v1237_v6 = vpop.f32.mrb[17].mxu0  ;;  %2590 = vmatpush3.msra.mxu0 %v2560_v5  ;;  %2584 = vmatprep.subr.mxu1 %v2857_v9 }
 0x30e   : > { %2592 = vmatmul.mubr.msk.f32.vlgmr.msra.gmra.mrb[20].mxu0 %vm529_vm3, %v3191_v24  ;;  %2599 = vmatprep.subr.mxu0 %v2857_v9 }
 0x30f   : > { %2582 = vmatmul.mubr.msk.f32.vlgmr.msra.gmra.mrb[18].mxu1 %vm529_vm3, %v3171_v20  ;;  %2601 = vmatprep.mubr.msk.f32.mxu0 %vm2858_vm2, %v2857_v9 }
 0x310   : > { %2585 = vmatpush3.msra.mxu1 %v1237_v6  ;;  %2586 = vmatprep.mubr.msk.f32.mxu1 %vm2858_vm2, %v2857_v9  ;;  %v2563_v7 = vpop.f32.mrb[18].mxu0 }
 0x311   : > { %v1247_v8 = vpop.f32.mrb[19].mxu0  ;;  %2594 = vmatprep.subr.mxu1 %v2857_v9  ;;  %2600 = vmatpush3.msra.mxu0 %v2563_v7 }
 0x312   : > { %2602 = vmatmul.mubr.msk.f32.vlgmr.msra.gmra.mrb[22].mxu0 %vm529_vm3, %v3201_v25  ;;  %2117 = vmatprep.subr.bf16.mxu0 %v2413_v17  ;;  %v2859_v25 = vmov 0  }
 0x313   : > { %2587 = vmatmul.mubr.msk.f32.vlgmr.msra.gmra.mrb[20].mxu1 %vm529_vm3, %v3159_v18  ;;  %v1912_v18 = vld [vmem:[%s3087_s22 + $0x40] sm:$0xff]  ;;  %2118 = vmatpush1.bf16.msra.mxu0 %v2412_v16 }
 0x314   : > { %2595 = vmatpush3.msra.mxu1 %v1247_v8  ;;  %2596 = vmatprep.mubr.msk.f32.mxu1 %vm2858_vm2, %v2857_v9  ;;  %v1913_v9 = vld [vmem:[%s3087_s22 + $0x48] sm:$0xff]  ;;  %v2418_v20 = vcombine.low %v1912_v18, %v1916_v19  ;;  %v2419_v21 = vcombine.high %v1912_v18, %v1916_v19 }
 0x315   : > { %2076 = vmatprep.subr.bf16.mxu1 %v2411_v13  ;;  %2149 = vmatprep.mubr.bf16.mxu0 %v2859_v25 }
 0x317   : > { %2597 = vmatmul.mubr.msk.f32.vlgmr.msra.gmra.mrb[22].mxu1 %vm529_vm3, %v3176_v22  ;;  %v1917_v22 = vld [vmem:[%s3087_s22 + $0x68] sm:$0xff] }
 0x318   : > { %2077 = vmatpush1.bf16.msra.mxu1 %v2410_v15  ;;  %v2420_v23 = vcombine.low %v1913_v9, %v1917_v22  ;;  %v2421_v24 = vcombine.high %v1913_v9, %v1917_v22  ;;  %2108 = vmatprep.mubr.bf16.mxu1 %v2859_v25 }
 0x319   : > { %2078 = vmatprep.subr.bf16.mxu1 %v2419_v21 }
 0x31a   : > { %2119 = vmatprep.subr.bf16.mxu0 %v2421_v24 }
 0x31b   : > { %2120 = vmatpush1.bf16.msra.mxu0 %v2420_v23 }
 0x31c   : > { %2079 = vmatpush1.bf16.msra.mxu1 %v2418_v20  ;;  %2199 = vmatprep.subr.bf16.mxu0 %v2417_v33 }
 0x31d   : > { %2158 = vmatprep.subr.bf16.mxu1 %v2415_v30 }
 0x3d6   : > { %v1329_v35 = vpop.f32.mrb[12].mxu1 }
 0x3d7   : > { %v1330_v36 = vadd.f32 %v2401_v34, %v1329_v35  ;;  %v2568_v37 = vpop.f32.mrb[13].mxu1 }
 0x3d9   : > { %v1823_v38 = vmax.f32 %v1330_v36, 0.0 }
 0x3da   : > { %v1399_v39 = vpop.f32.mrb[14].mxu1 }
 0x3db   : > { %v1831_v40 = vsel %vm1126_vm4, %v1823_v38, 0.0  ;;  %v1400_v41 = vadd.f32 %v2401_v34, %v1399_v39  ;;  %v2573_v42 = vpop.f32.mrb[15].mxu1 }
 0x3dc   : > { %v1832_v43 = vrot.slane %v1831_v40, 4 }
 0x3dd   : > { %v1824_v44 = vmax.f32 %v1400_v41, 0.0 }
 0x3de   : > { %v1833_v45 = vadd.f32 %v1832_v43, %v1831_v40  ;;  %v1469_v46 = vpop.f32.mrb[16].mxu1 }
 0x3df   : > { %v1838_v47 = vsel %vm1126_vm4, %v1824_v44, 0.0  ;;  %v1470_v48 = vadd.f32 %v2401_v34, %v1469_v46  ;;  %v2578_v49 = vpop.f32.mrb[17].mxu1 }
 0x3e0   : > { %v1834_v50 = vrot.slane %v1833_v45, 2  ;;  %v1839_v51 = vrot.slane %v1838_v47, 4 }
 0x3e1   : > { %v1825_v52 = vmax.f32 %v1470_v48, 0.0  ;;  %v1679_v53 = vpop.f32.mrb[20].mxu0 }
 0x3e2   : > { %v1835_v54 = vadd.f32 %v1834_v50, %v1833_v45  ;;  %v1840_v55 = vadd.f32 %v1839_v51, %v1838_v47  ;;  %v1539_v56 = vpop.f32.mrb[18].mxu1  ;;  %v1680_v57 = vadd.f32 %v2401_v34, %v1679_v53  ;;  %v2593_v58 = vpop.f32.mrb[21].mxu0 }
 0x3e3   : > { %v1845_v59 = vsel %vm1126_vm4, %v1825_v52, 0.0  ;;  %v1540_v60 = vadd.f32 %v2401_v34, %v1539_v56  ;;  %v2583_v61 = vpop.f32.mrb[19].mxu1 }
 0x3e4   : > { %v1836_v62 = vrot.slane %v1835_v54, 1  ;;  %v1841_v63 = vrot.slane %v1840_v55, 2  ;;  %v1846_v0 = vrot.slane %v1845_v59, 4  ;;  %v1828_v1 = vmax.f32 %v1680_v57, 0.0 }
 0x3e5   : > { %v1826_v2 = vmax.f32 %v1540_v60, 0.0  ;;  %v1819_v3 = vpop.f32.mrb[22].mxu0 }
 0x3e6   : > { %v1837_v4 = vadd.f32 %v1836_v62, %v1835_v54  ;;  %v1842_v5 = vadd.f32 %v1841_v63, %v1840_v55  ;;  %v1847_v6 = vadd.f32 %v1846_v0, %v1845_v59  ;;  %v1609_v7 = vpop.f32.mrb[20].mxu1  ;;  %v1866_v8 = vsel %vm1126_vm4, %v1828_v1, 0.0  ;;  %v2603_v10 = vpop.f32.mrb[23].mxu0 }
 0x3e7   : > { %v1852_v11 = vsel %vm1126_vm4, %v1826_v2, 0.0  ;;  %v1610_v12 = vadd.f32 %v2401_v34, %v1609_v7  ;;  %v1867_v13 = vrot.slane %v1866_v8, 4  ;;  %v2588_v14 = vpop.f32.mrb[21].mxu1  ;;  %v1820_v15 = vadd.f32 %v2401_v34, %v1819_v3 }
 0x3e8   : > { %v1888_v16 = vmul.f32 0.125, %v1837_v4  ;;  %v1843_v17 = vrot.slane %v1842_v5, 1  ;;  %v1848_v18 = vrot.slane %v1847_v6, 2  ;;  %v1853_v19 = vrot.slane %v1852_v11, 4 }
 0x3e9   : > { %v1827_v9 = vmax.f32 %v1610_v12, 0.0  ;;  %v1868_v20 = vadd.f32 %v1867_v13, %v1866_v8  ;;  %v1830_v21 = vmax.f32 %v1820_v15, 0.0 }
 0x3ea   : > { %v1896_v22 = vpack.c.bf16 %v1888_v16, %v1888_v16  ;;  %v1844_v23 = vadd.f32 %v1843_v17, %v1842_v5  ;;  %v1849_v24 = vadd.f32 %v1848_v18, %v1847_v6  ;;  %v1854_v30 = vadd.f32 %v1853_v19, %v1852_v11  ;;  %v1749_v33 = vpop.f32.mrb[22].mxu1 }
 0x3eb   : > { %v1859_v35 = vsel %vm1126_vm4, %v1827_v9, 0.0  ;;  %v1869_v36 = vrot.slane %v1868_v20, 2  ;;  %v1750_v37 = vadd.f32 %v2401_v34, %v1749_v33  ;;  %v1880_v38 = vsel %vm1126_vm4, %v1830_v21, 0.0  ;;  %v2598_v39 = vpop.f32.mrb[23].mxu1 }
 0x3ec   : > { %v1889_v40 = vmul.f32 0.125, %v1844_v23  ;;  %v1850_v41 = vrot.slane %v1849_v24, 1  ;;  %v1855_v42 = vrot.slane %v1854_v30, 2  ;;  %v1860_v43 = vrot.slane %v1859_v35, 4 }
 0x3ed   : > { %v1870_v44 = vadd.f32 %v1869_v36, %v1868_v20  ;;  %v1829_v45 = vmax.f32 %v1750_v37, 0.0  ;;  %v1881_v46 = vrot.slane %v1880_v38, 4  ;;  %v1970_v47 = vunpack.c.l.b16 %v1896_v22 }
 0x3ee   : > { %v1897_v48 = vpack.c.bf16 %v1889_v40, %v1889_v40  ;;  %v1851_v49 = vadd.f32 %v1850_v41, %v1849_v24  ;;  %v1856_v50 = vadd.f32 %v1855_v42, %v1854_v30  ;;  %v1861_v51 = vadd.f32 %v1860_v43, %v1859_v35  ;;  %v1918_v40 = vld [vmem:[%s3087_s22 + $0x70] sm:$0xff]  ;;  %v1915_v41 = vld [vmem:[%s3087_s22 + $0x58] sm:$0xff] }
 0x3ef   : > { %v1871_v52 = vrot.slane %v1870_v44, 1  ;;  %v1873_v53 = vsel %vm1126_vm4, %v1829_v45, 0.0  ;;  %v1882_v34 = vadd.f32 %v1881_v46, %v1880_v38  ;;  %v1914_v38 = vld [vmem:[%s3087_s22 + $0x50] sm:$0xff]  ;;  %v1919_v42 = vld [vmem:[%s3087_s22 + $0x78] sm:$0xff]  ;;  %s2374_s22 = sshll.u32 %s2927_s9, 3  ;;  %s2249_s9 = scalar_lea.sflag [#allocation4], %s3084_s27 }
 0x3f0   : > { %v1971_v54 = vunpack.c.l.b16 %v1897_v48  ;;  %v1890_v55 = vmul.f32 0.125, %v1851_v49  ;;  %v1857_v56 = vrot.slane %v1856_v50, 1  ;;  %v1874_v57 = vrot.slane %v1873_v53, 4  ;;  %p365_p9 = scmp.lt.s32.totalorder %s2374_s22, 39 }
 0x3f1   : > { %v1862_v58 = vrot.slane %v1861_v51, 2  ;;  %v1872_v59 = vadd.f32 %v1871_v52, %v1870_v44  ;;  %v1883_v60 = vrot.slane %v1882_v34, 2  ;;  %v2423_v46 = vcombine.high %v1914_v38, %v1918_v40 }
 0x3f2   : > { %v1979_v61 = vsel %vm1978_vm5, %v1971_v54, %v1970_v47  ;;  %v1898_v62 = vpack.c.bf16 %v1890_v55, %v1890_v55  ;;  %v1858_v63 = vadd.f32 %v1857_v56, %v1856_v50  ;;  %v1875_v0 = vadd.f32 %v1874_v57, %v1873_v53  ;;  %s3414_s22 = smov (!%p365_p9, %s2374_s22), 39 }
 0x3f3   : > { %v1863_v1 = vadd.f32 %v1862_v58, %v1861_v51  ;;  %v1884_v2 = vadd.f32 %v1883_v60, %v1882_v34  ;;  %v1893_v11 = vmul.f32 0.125, %v1872_v59  ;;  %v2425_v47 = vcombine.high %v1915_v41, %v1919_v42  ;;  %s367_s16 = scalar_lea.vmem %s3373_s7, %s3414_s22 }
 0x3f4   : > { %v1972_v3 = vunpack.c.l.b16 %v1898_v62  ;;  %v1891_v4 = vmul.f32 0.125, %v1858_v63  ;;  %v1876_v5 = vrot.slane %v1875_v0, 2  ;;  %v2422_v48 = vcombine.low %v1914_v38, %v1918_v40  ;;  %v1920_v31 = vld [vmem:[%s367_s16] sm:$0xff] }
 0x3f5   : > { %v1864_v6 = vrot.slane %v1863_v1, 1  ;;  %v1885_v7 = vrot.slane %v1884_v2, 1  ;;  %v1901_v9 = vpack.c.bf16 %v1893_v11, %v1893_v11  ;;  %v2424_v49 = vcombine.low %v1915_v41, %v1919_v42 }
 0x3f6   : > { %v1981_v8 = vsel %vm1980_vm6, %v1972_v3, %v1979_v61  ;;  %v1899_v10 = vpack.c.bf16 %v1891_v4, %v1891_v4  ;;  %v1877_v12 = vadd.f32 %v1876_v5, %v1875_v0  ;;  %v1925_v50 = vrot.slane %v1920_v31, %v1924_v28 }
 0x3f7   : > { %v1865_v13 = vadd.f32 %v1864_v6, %v1863_v1  ;;  %v1886_v14 = vadd.f32 %v1885_v7, %v1884_v2  ;;  %v1975_v30 = vunpack.c.l.b16 %v1901_v9  ;;  %v1940_v59 = vsub.s32 4, %v1923_v27 }
 0x3f8   : > { %v1973_v15 = vunpack.c.l.b16 %v1899_v10  ;;  %v1878_v16 = vrot.slane %v1877_v12, 1  ;;  %v1948_v60 = vsub.s32 6, %v1923_v27  ;;  %v1944_v1 = vsub.s32 5, %v1923_v27 }
 0x3f9   : > { %v1892_v17 = vmul.f32 0.125, %v1865_v13  ;;  %v1895_v18 = vmul.f32 0.125, %v1886_v14  ;;  %v1952_v2 = vsub.s32 7, %v1923_v27  ;;  %v1941_v5 = vrot.slane %v1920_v31, %v1940_v59 }
 0x3fa   : > { %v1983_v19 = vsel %vm1982_vm7, %v1973_v15, %v1981_v8  ;;  %v1879_v20 = vadd.f32 %v1878_v16, %v1877_v12  ;;  %v1949_v6 = vrot.slane %v1920_v31, %v1948_v60  ;;  %v1945_v7 = vrot.slane %v1920_v31, %v1944_v1 }
 0x3fb   : > { %v1900_v21 = vpack.c.bf16 %v1892_v17, %v1892_v17  ;;  %v1903_v24 = vpack.c.bf16 %v1895_v18, %v1895_v18  ;;  %v1953_v8 = vrot.slane %v1920_v31, %v1952_v2 }
 0x3fc   : > { %v1894_v22 = vmul.f32 0.125, %v1879_v20 }
 0x3fd   : > { %v1974_v23 = vunpack.c.l.b16 %v1900_v21  ;;  %v1977_v39 = vunpack.c.l.b16 %v1903_v24 }
 0x3fe   : > { %v1902_v33 = vpack.c.bf16 %v1894_v22, %v1894_v22 }
 0x3ff   : > { %v1985_v35 = vsel %vm1984_vm8, %v1974_v23, %v1983_v19 }
 0x400   : > { %v1987_v36 = vsel %vm1986_vm9, %v1975_v30, %v1985_v35  ;;  %v1976_v37 = vunpack.c.l.b16 %v1902_v33 }
 0x402   : > { %v1989_v43 = vsel %vm1988_vm10, %v1976_v37, %v1987_v36 }
 0x403   : > { %v1991_v44 = vsel %vm1990_vm11, %v1977_v39, %v1989_v43 }
 0x404   : > { %v1992_v45 = vpack.c.b16 %v1991_v44, %v1991_v44 }
 0x406   : > { %2426 = vmatmul.mubr.msk.bf16.vlgmr.msra.gmra.mrb[24].mxu1 %vm1126_vm4, %v1992_v45  ;;  %2427 = vmatmul.mubr.msk.bf16.vlgmr.msra.gmra.mrb[24].mxu0 %vm1126_vm4, %v1992_v45 }
 0x407   : > { %2159 = vmatpush1.bf16.msra.mxu1 %v2414_v29  ;;  %2200 = vmatpush1.bf16.msra.mxu0 %v2416_v32  ;;  %v1932_v29 = vsub.s32 2, %v1923_v27  ;;  %v1936_v32 = vsub.s32 3, %v1923_v27 }
 0x408   : > { %2160 = vmatprep.subr.bf16.mxu1 %v2423_v46  ;;  %2201 = vmatprep.subr.bf16.mxu0 %v2425_v47 }
 0x409   : > { %2190 = vmatprep.mubr.bf16.mxu1 %v2859_v25  ;;  %2231 = vmatprep.mubr.bf16.mxu0 %v2859_v25  ;;  %v1928_v25 = vsub.s32 1, %v1923_v27  ;;  %v1933_v51 = vrot.slane %v1920_v31, %v1932_v29  ;;  %v1937_v53 = vrot.slane %v1920_v31, %v1936_v32 }
 0x40b   : > { %2161 = vmatpush1.bf16.msra.mxu1 %v2422_v48  ;;  %2202 = vmatpush1.bf16.msra.mxu0 %v2424_v49  ;;  %v1929_v52 = vrot.slane %v1920_v31, %v1928_v25 }
 0x40e   : > { %2428 = vmatmul.mubr.msk.bf16.vlgmr.msra.gmra.mrb[28].mxu1 %vm1126_vm4, %v1992_v45  ;;  %2429 = vmatmul.mubr.msk.bf16.vlgmr.msra.gmra.mrb[28].mxu0 %vm1126_vm4, %v1992_v45 }
 0x4d9   : > { %v2110_v34 = vpop.f32.mrb[24].mxu1  ;;  %v2151_v54 = vpop.f32.mrb[24].mxu0 }
 0x4da   : > { %v2111_v55 = vadd.f32 %v2110_v34, %v1925_v50  ;;  %v2152_v56 = vadd.f32 %v2151_v54, %v1933_v51  ;;  %v2112_v57 = vpop.f32.mrb[25].mxu1  ;;  %v2153_v58 = vpop.f32.mrb[25].mxu0 }
 0x4db   : > { %v2113_v61 = vadd.f32 %v2112_v57, %v1929_v52  ;;  %v2154_v62 = vadd.f32 %v2153_v58, %v1937_v53  ;;  %v2114_v63 = vpop.f32.mrb[26].mxu1  ;;  %v2155_v0 = vpop.f32.mrb[26].mxu0 }
 0x4dc   : > { %2240 = vst [vmem:[%s362_s13] sm:$0xff] %v2111_v55  ;;  %2242 = vst [vmem:[%s362_s13 + $0x10] sm:$0xff] %v2152_v56  ;;  %v2115_v3 = vpop.f32.mrb[27].mxu1  ;;  %v2156_v4 = vpop.f32.mrb[27].mxu0 }
 0x4dd   : > { %2241 = vst [vmem:[%s362_s13 + $0x8] sm:$0xff] %v2113_v61  ;;  %2243 = vst [vmem:[%s362_s13 + $0x18] sm:$0xff] %v2154_v62 }
 0x4e1   : > { %v2192_v10 = vpop.f32.mrb[28].mxu1  ;;  %v2233_v11 = vpop.f32.mrb[28].mxu0 }
 0x4e2   : > { %v2193_v12 = vadd.f32 %v2192_v10, %v1941_v5  ;;  %v2234_v13 = vadd.f32 %v2233_v11, %v1949_v6  ;;  %v2194_v14 = vpop.f32.mrb[29].mxu1  ;;  %v2235_v15 = vpop.f32.mrb[29].mxu0 }
 0x4e3   : > { %v2195_v16 = vadd.f32 %v2194_v14, %v1945_v7  ;;  %v2236_v17 = vadd.f32 %v2235_v15, %v1953_v8  ;;  %v2196_v18 = vpop.f32.mrb[30].mxu1  ;;  %v2237_v19 = vpop.f32.mrb[30].mxu0 }
 0x4e4   : > { %2244 = vst [vmem:[%s362_s13 + $0x20] sm:$0xff] %v2193_v12  ;;  %2246 = vst [vmem:[%s362_s13 + $0x30] sm:$0xff] %v2234_v13  ;;  %v2197_v9 = vpop.f32.mrb[31].mxu1  ;;  %v2238_v20 = vpop.f32.mrb[31].mxu0 }
 0x4e5   : > { %2245 = vst [vmem:[%s362_s13 + $0x28] sm:$0xff] %v2195_v16  ;;  %2247 = vst [vmem:[%s362_s13 + $0x38] sm:$0xff] %v2236_v17 }
 0x4e6   : > { %2786 = shalt.err (!%p2783_p4)
}
 0x4e7   : > { %s2787_s27 = scalar_lea.hbm %s3323_s23, 1024  ;;  %s2791_s22 = scalar_lea.hbm %s3374_s8, 5120 }
 0x4e8   : > { %p2788_p11 = scmp.ne.s32.totalorder %s3323_s23, %s2787_s27  ;;  %p2792_p5 = scmp.lt.u32.totalorder %s3323_s23, %s3374_s8 }
 0x4e9   : > { %p2793_p8 = scmp.lt.u32.totalorder %s2791_s22, %s2787_s27  ;;  %p2795_p10 = scmp.lt.u32.totalorder %s2787_s27, %s3323_s23 }
 0x4ea   : > { %p2789_p3 = pnand %p2788_p11, %p3404_p1 }
 0x4eb   : > { %p2794_p9 = por %p2793_p8, %p2792_p5 }
 0x4ec   : > { %p2790_p7 = pneg %p2789_p3 }
 0x4ed   : > { %p2796_p2 = por %p2795_p10, %p2794_p9 }
 0x4ef   : > { %p2797_p0 = pnand %p2796_p2, %p2790_p7 }
 0x4f1   : > { %2800 = shalt.err (!%p2797_p0)
}
 0x4f2   : > { %2622 = dma.vmem_to_hbm [thread:$0]  (%p3404_p1), %s3325_s15, 1024, %s3323_s23, %s2249_s9  }
 0x4f3 PF: > { %s3405_s16 = sld [smem:[#allocation13_spill]]  ;;  %s3406_s14 = sld [smem:[#allocation16_spill]] }
 0x4f4   : > { %p2644_p6 = scmp.ge.s32.totalorder %s2847_s30, 2 }
 0x4f9   : > { %s2275_s13 = sand.u32 1, %s3405_s16   ;;  %p3407_p12 = scmp.ne.s32.totalorder %s3406_s14, 0 }
 0x4fa   : > { %s2276_s20 = scalar_lea.sflag [#allocation4], %s2275_s13 }
 0x4fb   : > { %p2636_p13 = pnand %p2644_p6, %p3407_p12 }
 0x4fd   : > { %2830 = dma.done.wait (!%p2636_p13), %s2276_s20, 1024  }
 0x4fe   : > { %2832 = vsyncadd (!%p2636_p13), %s2276_s20, 4294966272  ;;  %s3408_s30 = sld [smem:[#allocation14_spill]]  ;;  %s3409_s24 = sld [smem:[#allocation15_spill]] }
 0x4ff   : > { %s3410_s27 = smov %s2839_s28  ;;  %s3411_s28 = smov %s2843_s29 }
 0x504   : > { %p20_p4 = scmp.ge.s32.totalorder %s3408_s30, 7   ;;  %s3412_s29 = smov %s3409_s24 }
 0x506   :  { %22 = sbr.rel (!%p20_p4) target bundleno = 7 (0x7), region = 107 }
 0x50d   :  { %2281 = vsyncpa [#allocation3], 1 }
 0x50e   :  { %2283 = vsyncpa [#allocation3 + $0x1], 1 }
 0x50f   :  { %2284 = vsyncpa [#allocation6], 1 }
 0x510   :  { %2285 = vsyncpa [#allocation4], 1 }
 0x511   :  { %2287 = vsyncpa [#allocation4 + $0x1], 1 }

</bundles_post_ra>
